<compile_context>
chip_gen: v7x
topology: tpu7x:2x2x1
jax: 0.10.0
libtpu: 0.0.40
codegen_flags: <defaults>
</compile_context>

<pallas_src>
import jax
import jax.numpy as jnp
from jax import lax
from jax.experimental import pallas as pl
from jax.experimental.pallas import tpu as pltpu

# ---------------------------------------------------------------------------
# Problem sizes (from the PyTorch module)
# ---------------------------------------------------------------------------
N, C, H, W = 1, 4, 10, 10          # input (NCHW)
C_OUT = 1
KH = KW = 8
STRIDE = 5
HO = (H - 1) * STRIDE + KH         # 53
WO = (W - 1) * STRIDE + KW         # 53

H_PAD = 16                         # iy rows per ky block in T_stack (2 sublane tiles)
HO_PAD = 56                        # output sublanes (multiple of 8)
WO_PAD = 128                       # output lanes (lane-dense)
KSTACK = KH * H_PAD                # 128 = contraction depth of 2nd matmul


# ---------------------------------------------------------------------------
# Pallas kernel: 4 tiny per-channel dots + 1 full-depth K=128 matmul.
# ---------------------------------------------------------------------------
def convT_kernel(x_ref, wk_ref, s_ref, b_ref, o_ref, t_ref):
    # x_ref : (1, C, H, W)       VMEM  raw NCHW input (no wrapper glue)
    # wk_ref: (C, W, KH*WO_PAD)  VMEM  x-scatter weights, col = ky*128 + x
    # s_ref : (HO_PAD, KSTACK)   VMEM  y-scatter matrix, col = ky*16 + iy
    # b_ref : (1,)               SMEM  bias scalar
    # o_ref : (HO_PAD, WO_PAD)   VMEM  padded output image
    # t_ref : (KSTACK, WO_PAD)   VMEM  scratch holding the stacked stage-1 result
    t_ref[...] = jnp.zeros_like(t_ref)            # zero the iy-padding rows once

    # Stage 1: x-direction scatter folded into per-channel MXU dots on the raw
    # input layout (avoids any transpose/pad of x, in- or out-of-kernel).
    t = jnp.dot(x_ref[0, 0], wk_ref[0], preferred_element_type=jnp.float32)
    for c in range(1, C):                         # static unroll (C = 4)
        t = t + jnp.dot(x_ref[0, c], wk_ref[c],
                        preferred_element_type=jnp.float32)       # (H, KH*128)

    # Stack the KH lane-tiles along sublanes: row r = ky*16 + iy.
    # Slice is lane-tile aligned, store is sublane-tile aligned -> plain vst.
    for ky in range(KH):                          # static unroll (KH = 8)
        t_ref[ky * H_PAD: ky * H_PAD + H, :] = t[:, ky * WO_PAD:(ky + 1) * WO_PAD]

    # Stage 2: y-direction scatter + ky reduction as ONE K=128 matmul; bias is
    # folded in; single lane-dense (56,128) store.
    o_ref[...] = (jnp.dot(s_ref[...], t_ref[...],
                          preferred_element_type=jnp.float32) + b_ref[0])


# ---------------------------------------------------------------------------
# One-time (weight-only) precompute — done at "module init", NOT per call.
# ---------------------------------------------------------------------------
def init_conv_transpose_params(weight, bias):
    """weight: (C, C_OUT, KH, KW) f32; bias: (C_OUT,) f32."""
    w_c = weight[:, 0].astype(jnp.float32)                       # (C, KH, KW)

    # Wk[c, ix, ky*128 + x] = w_c[c, ky, x - 5*ix]  if 0 <= x-5*ix < KW else 0
    ix = jnp.arange(W)
    xo = jnp.arange(WO_PAD)
    kx = xo[None, :] - STRIDE * ix[:, None]                      # (W, WO_PAD)
    valid = (kx >= 0) & (kx < KW)
    g = w_c[:, :, jnp.clip(kx, 0, KW - 1)]                       # (C, KH, W, 128)
    g = jnp.where(valid[None, None], g, 0.0)
    wk = jnp.transpose(g, (0, 2, 1, 3)).reshape(C, W, KH * WO_PAD)  # (4,10,1024)

    # S_big[y, ky*16 + iy] = [y == 5*iy + ky], zeroed outside the real 53x10 range.
    y = jnp.arange(HO_PAD)
    ky = jnp.arange(KH)
    iy = jnp.arange(H_PAD)
    s = ((y[:, None, None] == STRIDE * iy[None, None, :] + ky[None, :, None])
         & (y[:, None, None] < HO)
         & (iy[None, None, :] < H))
    s_big = s.astype(jnp.float32).reshape(HO_PAD, KSTACK)        # (56, 128)

    return wk, s_big, bias.astype(jnp.float32)


# ---------------------------------------------------------------------------
# Forward (hot path). No per-call glue before the kernel; gridless call.
# ---------------------------------------------------------------------------
@jax.jit
def conv_transpose2d_pallas(x_nchw, wk, s_big, bias):
    out_padded = pl.pallas_call(
        convT_kernel,
        out_shape=jax.ShapeDtypeStruct((HO_PAD, WO_PAD), jnp.float32),
        in_specs=[
            pl.BlockSpec(memory_space=pltpu.VMEM),   # x   (1, 4, 10, 10)
            pl.BlockSpec(memory_space=pltpu.VMEM),   # wk  (4, 10, 1024)
            pl.BlockSpec(memory_space=pltpu.VMEM),   # s   (56, 128)
            pl.BlockSpec(memory_space=pltpu.SMEM),   # bias (1,)
        ],
        out_specs=pl.BlockSpec(memory_space=pltpu.VMEM),
        scratch_shapes=[pltpu.VMEM((KSTACK, WO_PAD), jnp.float32)],
    )(x_nchw, wk, s_big, bias)

    v1 = out_padded[:HO, :WO].reshape(N, C_OUT, HO, WO)
    # v2..v6 of the PyTorch forward are dead code (module returns v1).
    return v1


# ---------------------------------------------------------------------------
# Reference (pure JAX) transposed convolution for verification.
# ---------------------------------------------------------------------------
def conv_transpose2d_ref(x_nchw, weight, bias):
    # ConvTranspose2d == dilated conv with spatially-flipped, axis-swapped kernel.
    w_oihw = jnp.flip(jnp.transpose(weight, (1, 0, 2, 3)), axis=(2, 3))
    out = lax.conv_general_dilated(
        x_nchw, w_oihw,
        window_strides=(1, 1),
        padding=((KH - 1, KH - 1), (KW - 1, KW - 1)),
        lhs_dilation=(STRIDE, STRIDE),
        dimension_numbers=("NCHW", "OIHW", "NCHW"),
        precision=lax.Precision.HIGHEST,
    )
    return out + bias.reshape(1, C_OUT, 1, 1)


if __name__ == "__main__":
    key = jax.random.PRNGKey(0)
    k_x, k_w, k_b = jax.random.split(key, 3)

    x1 = jax.random.normal(k_x, (N, C, H, W), dtype=jnp.float32)
    # Deterministic parameter init (shapes from nn.ConvTranspose2d(4, 1, 8)).
    fan = C * KH * KW
    bound = 1.0 / (fan ** 0.5)
    weight = jax.random.uniform(k_w, (C, C_OUT, KH, KW), jnp.float32,
                                minval=-bound, maxval=bound)
    bias = jax.random.uniform(k_b, (C_OUT,), jnp.float32,
                              minval=-bound, maxval=bound)

    # Weight-dependent scatter operands built ONCE (module init), reused per call.
    wk, s_big, b = init_conv_transpose_params(weight, bias)

    out = conv_transpose2d_pallas(x1, wk, s_big, b)
    out = jax.block_until_ready(out)

    ref = conv_transpose2d_ref(x1, weight, bias)
    assert out.shape == (N, C_OUT, HO, WO), out.shape
    assert jnp.allclose(out, ref, atol=2e-4, rtol=2e-4), \
        float(jnp.max(jnp.abs(out - ref)))

    print("KERNEL_OK")
</pallas_src>

<mosaic_0001>
module attributes {stable_mosaic.version = 11 : i64} {
  func.func @convT_kernel(%arg0: memref<1x4x10x10xf32, #tpu.memory_space<vmem>>, %arg1: memref<4x10x1024xf32, #tpu.memory_space<vmem>>, %arg2: memref<56x128xf32, #tpu.memory_space<vmem>>, %arg3: memref<1xf32, #tpu.memory_space<smem>>, %arg4: memref<56x128xf32, #tpu.memory_space<vmem>>, %arg5: memref<128x128xf32, #tpu.memory_space<vmem>>) attributes {dimension_semantics = [], scalar_prefetch = 0 : i64, scratch_operands = 1 : i64, tpu.core_type = #tpu.core_type<tc>} {
    %cst = arith.constant 0.000000e+00 : f32
    %0 = vector.broadcast %cst : f32 to vector<128x128xf32>
    %c0 = arith.constant 0 : index
    %c0_0 = arith.constant 0 : index
    %1 = vector.load %arg5[%c0, %c0_0] : memref<128x128xf32, #tpu.memory_space<vmem>>, vector<128x128xf32>
    tpu.vector_store %arg5[%c0, %c0_0], %0 {strides = array<i32>} : memref<128x128xf32, #tpu.memory_space<vmem>>, vector<128x128xf32>,
    %c0_1 = arith.constant 0 : index
    %c0_2 = arith.constant 0 : index
    %c0_3 = arith.constant 0 : index
    %c0_4 = arith.constant 0 : index
    %2 = vector.load %arg0[%c0_1, %c0_2, %c0_3, %c0_4] : memref<1x4x10x10xf32, #tpu.memory_space<vmem>>, vector<1x1x10x10xf32>
    %3 = vector.shape_cast %2 : vector<1x1x10x10xf32> to vector<10x10xf32>
    %c0_5 = arith.constant 0 : index
    %c0_6 = arith.constant 0 : index
    %c0_7 = arith.constant 0 : index
    %4 = vector.load %arg1[%c0_5, %c0_6, %c0_7] : memref<4x10x1024xf32, #tpu.memory_space<vmem>>, vector<1x10x1024xf32>
    %5 = vector.shape_cast %4 : vector<1x10x1024xf32> to vector<10x1024xf32>
    %cst_8 = arith.constant dense<0.000000e+00> : vector<10x1024xf32>
    %6 = tpu.matmul %3, %5, %cst_8 {dimension_numbers = #tpu.dot_dimension_numbers<[1], [0], [0], [1], [0, 0, 1, 1], [], []>} : vector<10x10xf32>, vector<10x1024xf32>, vector<10x1024xf32> -> vector<10x1024xf32>
    %c0_9 = arith.constant 0 : index
    %c1 = arith.constant 1 : index
    %c0_10 = arith.constant 0 : index
    %c0_11 = arith.constant 0 : index
    %7 = vector.load %arg0[%c0_9, %c1, %c0_10, %c0_11] : memref<1x4x10x10xf32, #tpu.memory_space<vmem>>, vector<1x1x10x10xf32>
    %8 = vector.shape_cast %7 : vector<1x1x10x10xf32> to vector<10x10xf32>
    %c1_12 = arith.constant 1 : index
    %c0_13 = arith.constant 0 : index
    %c0_14 = arith.constant 0 : index
    %9 = vector.load %arg1[%c1_12, %c0_13, %c0_14] : memref<4x10x1024xf32, #tpu.memory_space<vmem>>, vector<1x10x1024xf32>
    %10 = vector.shape_cast %9 : vector<1x10x1024xf32> to vector<10x1024xf32>
    %cst_15 = arith.constant dense<0.000000e+00> : vector<10x1024xf32>
    %11 = tpu.matmul %8, %10, %cst_15 {dimension_numbers = #tpu.dot_dimension_numbers<[1], [0], [0], [1], [0, 0, 1, 1], [], []>} : vector<10x10xf32>, vector<10x1024xf32>, vector<10x1024xf32> -> vector<10x1024xf32>
    %12 = arith.addf %6, %11 : vector<10x1024xf32>
    %c0_16 = arith.constant 0 : index
    %c2 = arith.constant 2 : index
    %c0_17 = arith.constant 0 : index
    %c0_18 = arith.constant 0 : index
    %13 = vector.load %arg0[%c0_16, %c2, %c0_17, %c0_18] : memref<1x4x10x10xf32, #tpu.memory_space<vmem>>, vector<1x1x10x10xf32>
    %14 = vector.shape_cast %13 : vector<1x1x10x10xf32> to vector<10x10xf32>
    %c2_19 = arith.constant 2 : index
    %c0_20 = arith.constant 0 : index
    %c0_21 = arith.constant 0 : index
    %15 = vector.load %arg1[%c2_19, %c0_20, %c0_21] : memref<4x10x1024xf32, #tpu.memory_space<vmem>>, vector<1x10x1024xf32>
    %16 = vector.shape_cast %15 : vector<1x10x1024xf32> to vector<10x1024xf32>
    %cst_22 = arith.constant dense<0.000000e+00> : vector<10x1024xf32>
    %17 = tpu.matmul %14, %16, %cst_22 {dimension_numbers = #tpu.dot_dimension_numbers<[1], [0], [0], [1], [0, 0, 1, 1], [], []>} : vector<10x10xf32>, vector<10x1024xf32>, vector<10x1024xf32> -> vector<10x1024xf32>
    %18 = arith.addf %12, %17 : vector<10x1024xf32>
    %c0_23 = arith.constant 0 : index
    %c3 = arith.constant 3 : index
    %c0_24 = arith.constant 0 : index
    %c0_25 = arith.constant 0 : index
    %19 = vector.load %arg0[%c0_23, %c3, %c0_24, %c0_25] : memref<1x4x10x10xf32, #tpu.memory_space<vmem>>, vector<1x1x10x10xf32>
    %20 = vector.shape_cast %19 : vector<1x1x10x10xf32> to vector<10x10xf32>
    %c3_26 = arith.constant 3 : index
    %c0_27 = arith.constant 0 : index
    %c0_28 = arith.constant 0 : index
    %21 = vector.load %arg1[%c3_26, %c0_27, %c0_28] : memref<4x10x1024xf32, #tpu.memory_space<vmem>>, vector<1x10x1024xf32>
    %22 = vector.shape_cast %21 : vector<1x10x1024xf32> to vector<10x1024xf32>
    %cst_29 = arith.constant dense<0.000000e+00> : vector<10x1024xf32>
    %23 = tpu.matmul %20, %22, %cst_29 {dimension_numbers = #tpu.dot_dimension_numbers<[1], [0], [0], [1], [0, 0, 1, 1], [], []>} : vector<10x10xf32>, vector<10x1024xf32>, vector<10x1024xf32> -> vector<10x1024xf32>
    %24 = arith.addf %18, %23 : vector<10x1024xf32>
    %25 = vector.extract_strided_slice %24 {offsets = [0, 0], sizes = [10, 128], strides = [1, 1]} : vector<10x1024xf32> to vector<10x128xf32>
    %c0_30 = arith.constant 0 : index
    %c0_31 = arith.constant 0 : index
    %26 = vector.load %arg5[%c0_30, %c0_31] : memref<128x128xf32, #tpu.memory_space<vmem>>, vector<10x128xf32>
    tpu.vector_store %arg5[%c0_30, %c0_31], %25 {strides = array<i32>} : memref<128x128xf32, #tpu.memory_space<vmem>>, vector<10x128xf32>,
    %27 = vector.extract_strided_slice %24 {offsets = [0, 128], sizes = [10, 128], strides = [1, 1]} : vector<10x1024xf32> to vector<10x128xf32>
    %c16 = arith.constant 16 : index
    %c0_32 = arith.constant 0 : index
    %28 = vector.load %arg5[%c16, %c0_32] : memref<128x128xf32, #tpu.memory_space<vmem>>, vector<10x128xf32>
    tpu.vector_store %arg5[%c16, %c0_32], %27 {strides = array<i32>} : memref<128x128xf32, #tpu.memory_space<vmem>>, vector<10x128xf32>,
    %29 = vector.extract_strided_slice %24 {offsets = [0, 256], sizes = [10, 128], strides = [1, 1]} : vector<10x1024xf32> to vector<10x128xf32>
    %c32 = arith.constant 32 : index
    %c0_33 = arith.constant 0 : index
    %30 = vector.load %arg5[%c32, %c0_33] : memref<128x128xf32, #tpu.memory_space<vmem>>, vector<10x128xf32>
    tpu.vector_store %arg5[%c32, %c0_33], %29 {strides = array<i32>} : memref<128x128xf32, #tpu.memory_space<vmem>>, vector<10x128xf32>,
    %31 = vector.extract_strided_slice %24 {offsets = [0, 384], sizes = [10, 128], strides = [1, 1]} : vector<10x1024xf32> to vector<10x128xf32>
    %c48 = arith.constant 48 : index
    %c0_34 = arith.constant 0 : index
    %32 = vector.load %arg5[%c48, %c0_34] : memref<128x128xf32, #tpu.memory_space<vmem>>, vector<10x128xf32>
    tpu.vector_store %arg5[%c48, %c0_34], %31 {strides = array<i32>} : memref<128x128xf32, #tpu.memory_space<vmem>>, vector<10x128xf32>,
    %33 = vector.extract_strided_slice %24 {offsets = [0, 512], sizes = [10, 128], strides = [1, 1]} : vector<10x1024xf32> to vector<10x128xf32>
    %c64 = arith.constant 64 : index
    %c0_35 = arith.constant 0 : index
    %34 = vector.load %arg5[%c64, %c0_35] : memref<128x128xf32, #tpu.memory_space<vmem>>, vector<10x128xf32>
    tpu.vector_store %arg5[%c64, %c0_35], %33 {strides = array<i32>} : memref<128x128xf32, #tpu.memory_space<vmem>>, vector<10x128xf32>,
    %35 = vector.extract_strided_slice %24 {offsets = [0, 640], sizes = [10, 128], strides = [1, 1]} : vector<10x1024xf32> to vector<10x128xf32>
    %c80 = arith.constant 80 : index
    %c0_36 = arith.constant 0 : index
    %36 = vector.load %arg5[%c80, %c0_36] : memref<128x128xf32, #tpu.memory_space<vmem>>, vector<10x128xf32>
    tpu.vector_store %arg5[%c80, %c0_36], %35 {strides = array<i32>} : memref<128x128xf32, #tpu.memory_space<vmem>>, vector<10x128xf32>,
    %37 = vector.extract_strided_slice %24 {offsets = [0, 768], sizes = [10, 128], strides = [1, 1]} : vector<10x1024xf32> to vector<10x128xf32>
    %c96 = arith.constant 96 : index
    %c0_37 = arith.constant 0 : index
    %38 = vector.load %arg5[%c96, %c0_37] : memref<128x128xf32, #tpu.memory_space<vmem>>, vector<10x128xf32>
    tpu.vector_store %arg5[%c96, %c0_37], %37 {strides = array<i32>} : memref<128x128xf32, #tpu.memory_space<vmem>>, vector<10x128xf32>,
    %39 = vector.extract_strided_slice %24 {offsets = [0, 896], sizes = [10, 128], strides = [1, 1]} : vector<10x1024xf32> to vector<10x128xf32>
    %c112 = arith.constant 112 : index
    %c0_38 = arith.constant 0 : index
    %40 = vector.load %arg5[%c112, %c0_38] : memref<128x128xf32, #tpu.memory_space<vmem>>, vector<10x128xf32>
    tpu.vector_store %arg5[%c112, %c0_38], %39 {strides = array<i32>} : memref<128x128xf32, #tpu.memory_space<vmem>>, vector<10x128xf32>,
    %c0_39 = arith.constant 0 : index
    %c0_40 = arith.constant 0 : index
    %41 = vector.load %arg2[%c0_39, %c0_40] : memref<56x128xf32, #tpu.memory_space<vmem>>, vector<56x128xf32>
    %c0_41 = arith.constant 0 : index
    %c0_42 = arith.constant 0 : index
    %42 = vector.load %arg5[%c0_41, %c0_42] : memref<128x128xf32, #tpu.memory_space<vmem>>, vector<128x128xf32>
    %cst_43 = arith.constant dense<0.000000e+00> : vector<56x128xf32>
    %43 = tpu.matmul %41, %42, %cst_43 {dimension_numbers = #tpu.dot_dimension_numbers<[1], [0], [0], [1], [0, 0, 1, 1], [], []>} : vector<56x128xf32>, vector<128x128xf32>, vector<56x128xf32> -> vector<56x128xf32>
    %c0_44 = arith.constant 0 : index
    %44 = memref.load %arg3[%c0_44] : memref<1xf32, #tpu.memory_space<smem>>
    %45 = vector.broadcast %44 : f32 to vector<56x128xf32>
    %46 = arith.addf %43, %45 : vector<56x128xf32>
    %c0_45 = arith.constant 0 : index
    %c0_46 = arith.constant 0 : index
    %47 = vector.load %arg4[%c0_45, %c0_46] : memref<56x128xf32, #tpu.memory_space<vmem>>, vector<56x128xf32>
    tpu.vector_store %arg4[%c0_45, %c0_46], %46 {strides = array<i32>} : memref<56x128xf32, #tpu.memory_space<vmem>>, vector<56x128xf32>,
    return
  }
}

</mosaic_0001>

<bundles_post_ra>
// kernel: conv_transpose2d_pallas.1
= control target key start
LH: loop header
LB: loop body
LE: loop exit
PB: predicated region body
PF: predicated region fallthrough
CT: control target
= control target key end

     0   :  { %vm79_vm0 = vcmask 1041408   ;;  %vm2032_vm1 = vmmov 1   ;;  %v2033_v3 = vmov 0.0   ;;  %vm72_vm3 = vcmask 80896   ;;  %s2492_s1 = inlined_call_operand.vmem [shape: f32[4,10,1024], index: 1, kind: input, shape index: {}]   ;;  %s2493_s0 = inlined_call_operand.vmem [shape: f32[1,4,10,10], index: 0, kind: input, shape index: {}]   ;;  %s2494_s2 = inlined_call_operand.vmem [shape: f32[56,128], index: 2, kind: input, shape index: {}]   ;;  %s2495_s3 = inlined_call_operand.<no memory space> [shape: f32[1], index: 3, kind: input, shape index: {}]   ;;  %s2496_s4 = inlined_call_operand.vmem [shape: f32[56,128], index: 4, kind: output, shape index: {}]  }
   0x1   :  { %v1653_v0 = vld [vmem:[%s2492_s1 + $0x88] sm:$0xff]  ;;  %vm2067_vm2 = vmpackc.low %vm79_vm0, %vm2032_vm1  ;;  %168 = vmatprep.mubr.f32.mxu0 %v2033_v3  ;;  %19 = vst [vmem:[#allocation2 + $0x8] sm:$0xff] %v2033_v3  ;;  %245 = vmatprep.mubr.f32.mxu1 %v2033_v3  ;;  %v1655_v5 = vld [vmem:[%s2492_s1 + $0x98] sm:$0xff]  ;;  %v2034_v2 = vmov 0.0|0.0   ;;  %vm2035_vm4 = vmmov 0  }
   0x2   :  { %v1661_v1 = vld [vmem:[%s2492_s1 + $0xc8] sm:$0x3]  ;;  %21 = vst [vmem:[#allocation2 + $0x18] sm:$0xff] %v2033_v3  ;;  %23 = vst [vmem:[#allocation2 + $0x28] sm:$0xff] %v2033_v3  ;;  %v1663_v6 = vld [vmem:[%s2492_s1 + $0xd8] sm:$0x3] }
   0x3   :  { %25 = vst [vmem:[#allocation2 + $0x38] sm:$0xff] %v2033_v3  ;;  %27 = vst [vmem:[#allocation2 + $0x48] sm:$0xff] %v2033_v3  ;;  %v1844_v4 = vpack.c.bf16 %v1661_v1, %v1653_v0  ;;  %v1652_v7 = vld [vmem:[%s2492_s1 + $0x80] sm:$0xff]  ;;  %v1850_v8 = vpack.c.bf16 %v1663_v6, %v1655_v5  ;;  %v1654_v10 = vld [vmem:[%s2492_s1 + $0x90] sm:$0xff] }
   0x4   :  { %29 = vst [vmem:[#allocation2 + $0x58] sm:$0xff] %v2033_v3  ;;  %31 = vst [vmem:[#allocation2 + $0x68] sm:$0xff] %v2033_v3  ;;  %v1660_v9 = vld [vmem:[%s2492_s1 + $0xc0] sm:$0x3]  ;;  %v1662_v11 = vld [vmem:[%s2492_s1 + $0xd0] sm:$0x3] }
   0x5   :  { %33 = vst [vmem:[#allocation2 + $0x78] sm:$0xff] %v2033_v3  ;;  %1846 = vmatprep.subr.msk.bf16.mxu0 %vm2067_vm2, %v1844_v4  ;;  %v1847_v12 = vpack.c.bf16 %v1660_v9, %v1652_v7  ;;  %v1853_v13 = vpack.c.bf16 %v1662_v11, %v1654_v10  ;;  %v1657_v14 = vld [vmem:[%s2492_s1 + $0xa8] sm:$0xff]  ;;  %1852 = vmatprep.subr.msk.bf16.mxu1 %vm2067_vm2, %v1850_v8  ;;  %v1650_v16 = vld [vmem:[%s2493_s0 + $0x10] sm:$0xff]  ;;  %v1656_v18 = vld [vmem:[%s2492_s1 + $0xa0] sm:$0xff] }
   0x6   :  { %v1665_v15 = vld [vmem:[%s2492_s1 + $0xe8] sm:$0x3]  ;;  %v1664_v19 = vld [vmem:[%s2492_s1 + $0xe0] sm:$0x3]  ;;  %v1659_v21 = vld [vmem:[%s2492_s1 + $0xb8] sm:$0xff] }
   0x7   :  { %v1856_v17 = vpack.c.bf16 %v1665_v15, %v1657_v14  ;;  %1849 = vmatpush1.bf16.msk.msra.mxu0 %vm2067_vm2, %v1847_v12  ;;  %1855 = vmatpush1.bf16.msk.msra.mxu1 %vm2067_vm2, %v1853_v13  ;;  %v1859_v20 = vpack.c.bf16 %v1664_v19, %v1656_v18  ;;  %v1667_v22 = vld [vmem:[%s2492_s1 + $0xf8] sm:$0x3]  ;;  %v1658_v23 = vld [vmem:[%s2492_s1 + $0xb0] sm:$0xff]  ;;  %v37_v26 = vld [vmem:[%s2492_s1 + $0x8] sm:$0xff] }
   0x8   :  { %v1862_v24 = vpack.c.bf16 %v1667_v22, %v1659_v21  ;;  %v1666_v25 = vld [vmem:[%s2492_s1 + $0xf0] sm:$0x3]  ;;  %v45_v27 = vld [vmem:[%s2492_s1 + $0x48] sm:$0x3]  ;;  %v39_v30 = vld [vmem:[%s2492_s1 + $0x18] sm:$0xff] }
   0x9   :  { %1858 = vmatprep.subr.msk.bf16.mxu0 %vm2067_vm2, %v1856_v17  ;;  %v1865_v28 = vpack.c.bf16 %v1666_v25, %v1658_v23  ;;  %v1868_v29 = vpack.c.bf16 %v45_v27, %v37_v26  ;;  %v47_v31 = vld [vmem:[%s2492_s1 + $0x58] sm:$0x3]  ;;  %v36_v33 = vld [vmem:[%s2492_s1] sm:$0xff]  ;;  %v38_v36 = vld [vmem:[%s2492_s1 + $0x10] sm:$0xff] }
   0xa   :  { %1670 = vmatmul.mubr.msk.f32.vlgmr.msra.gmra.mrb[0].mxu0 %vm72_vm3, %v1650_v16  ;;  %1674 = vmatmul.mubr.msk.f32.vlgmr.msra.gmra.mrb[0].mxu1 %vm72_vm3, %v1650_v16  ;;  %v1651_v32 = vld [vmem:[%s2493_s0 + $0x18] sm:$0x3]  ;;  %v44_v34 = vld [vmem:[%s2492_s1 + $0x40] sm:$0x3]  ;;  %v1874_v35 = vpack.c.bf16 %v47_v31, %v39_v30  ;;  %v46_v37 = vld [vmem:[%s2492_s1 + $0x50] sm:$0x3] }
   0xb   :  { %1861 = vmatpush1.bf16.msk.msra.mxu0 %vm2067_vm2, %v1859_v20  ;;  %174 = vmatprep.mubr.f32.mxu0 %v2033_v3  ;;  %v41_v38 = vld [vmem:[%s2492_s1 + $0x28] sm:$0xff]  ;;  %v43_v40 = vld [vmem:[%s2492_s1 + $0x38] sm:$0xff]  ;;  %v1871_v42 = vpack.c.bf16 %v44_v34, %v36_v33  ;;  %v1877_v43 = vpack.c.bf16 %v46_v37, %v38_v36  ;;  %v40_v46 = vld [vmem:[%s2492_s1 + $0x20] sm:$0xff] }
   0xc   :  { %251 = vmatprep.mubr.f32.mxu1 %v2033_v3  ;;  %1864 = vmatprep.subr.msk.bf16.mxu1 %vm2067_vm2, %v1862_v24  ;;  %v49_v39 = vld [vmem:[%s2492_s1 + $0x68] sm:$0x3]  ;;  %v51_v41 = vld [vmem:[%s2492_s1 + $0x78] sm:$0x3]  ;;  %v48_v47 = vld [vmem:[%s2492_s1 + $0x60] sm:$0x3] }
   0xd   :  { %1867 = vmatpush1.bf16.msk.msra.mxu1 %vm2067_vm2, %v1865_v28  ;;  %1870 = vmatprep.subr.msk.bf16.mxu0 %vm2067_vm2, %v1868_v29  ;;  %v1880_v44 = vpack.c.bf16 %v49_v39, %v41_v38  ;;  %v1886_v45 = vpack.c.bf16 %v51_v41, %v43_v40  ;;  %v42_v48 = vld [vmem:[%s2492_s1 + $0x30] sm:$0xff]  ;;  %v1703_v50 = vld [vmem:[%s2492_s1 + $0x108] sm:$0xff]  ;;  %v1705_v52 = vld [vmem:[%s2492_s1 + $0x118] sm:$0xff]  ;;  %v1883_v55 = vpack.c.bf16 %v48_v47, %v40_v46 }
   0xe   :  { %1671 = vmatmul.mubr.msk.f32.gmra.mrb[2].mxu0 %vm72_vm3, %v1651_v32  ;;  %1675 = vmatmul.mubr.msk.f32.gmra.mrb[2].mxu1 %vm72_vm3, %v1651_v32  ;;  %v50_v49 = vld [vmem:[%s2492_s1 + $0x70] sm:$0x3]  ;;  %v1711_v51 = vld [vmem:[%s2492_s1 + $0x148] sm:$0x3]  ;;  %v1713_v53 = vld [vmem:[%s2492_s1 + $0x158] sm:$0x3] }
   0xf   :  { %322 = vmatprep.mubr.f32.mxu0 %v2033_v3  ;;  %399 = vmatprep.mubr.f32.mxu1 %v2033_v3  ;;  %v34_v54 = vld [vmem:[%s2493_s0] sm:$0xff]  ;;  %v1889_v56 = vpack.c.bf16 %v50_v49, %v42_v48  ;;  %v1892_v57 = vpack.c.bf16 %v1711_v51, %v1703_v50  ;;  %v1898_v58 = vpack.c.bf16 %v1713_v53, %v1705_v52  ;;  %v35_v59 = vld [vmem:[%s2493_s0 + $0x8] sm:$0x3]  ;;  %v1704_v62 = vld [vmem:[%s2492_s1 + $0x110] sm:$0xff] }
  0x10   :  { %1876 = vmatprep.subr.msk.bf16.mxu1 %vm2067_vm2, %v1874_v35  ;;  %v1702_v60 = vld [vmem:[%s2492_s1 + $0x100] sm:$0xff]  ;;  %v1712_v63 = vld [vmem:[%s2492_s1 + $0x150] sm:$0x3]  ;;  %v1707_v0 = vld [vmem:[%s2492_s1 + $0x128] sm:$0xff] }
  0x11   :  { %v1710_v61 = vld [vmem:[%s2492_s1 + $0x140] sm:$0x3]  ;;  %v1715_v1 = vld [vmem:[%s2492_s1 + $0x168] sm:$0x3]  ;;  %v1709_v4 = vld [vmem:[%s2492_s1 + $0x138] sm:$0xff]  ;;  %v1901_v7 = vpack.c.bf16 %v1712_v63, %v1704_v62 }
  0x12   :  { %1678 = vmatmul.mubr.msk.f32.vlgmr.msra.gmra.mrb[4].mxu0 %vm72_vm3, %v1650_v16  ;;  %1682 = vmatmul.mubr.msk.f32.vlgmr.msra.gmra.mrb[4].mxu1 %vm72_vm3, %v1650_v16  ;;  %v1717_v5 = vld [vmem:[%s2492_s1 + $0x178] sm:$0x3]  ;;  %v1895_v6 = vpack.c.bf16 %v1710_v61, %v1702_v60  ;;  %v1904_v8 = vpack.c.bf16 %v1715_v1, %v1707_v0  ;;  %v1706_v10 = vld [vmem:[%s2492_s1 + $0x120] sm:$0xff]  ;;  %v1708_v12 = vld [vmem:[%s2492_s1 + $0x130] sm:$0xff] }
  0x13   :  { %1873 = vmatpush1.bf16.msk.msra.mxu0 %vm2067_vm2, %v1871_v42  ;;  %328 = vmatprep.mubr.f32.mxu0 %v2033_v3  ;;  %v1910_v9 = vpack.c.bf16 %v1717_v5, %v1709_v4  ;;  %v1714_v11 = vld [vmem:[%s2492_s1 + $0x160] sm:$0x3]  ;;  %v1716_v13 = vld [vmem:[%s2492_s1 + $0x170] sm:$0x3]  ;;  %v1737_v14 = vld [vmem:[%s2492_s1 + $0x188] sm:$0xff] }
  0x14   :  { %405 = vmatprep.mubr.f32.mxu1 %v2033_v3  ;;  %1879 = vmatpush1.bf16.msk.msra.mxu1 %vm2067_vm2, %v1877_v43  ;;  %v1745_v15 = vld [vmem:[%s2492_s1 + $0x1c8] sm:$0x3]  ;;  %v1739_v16 = vld [vmem:[%s2492_s1 + $0x198] sm:$0xff]  ;;  %v1700_v18 = vld [vmem:[%s2493_s0 + $0x20] sm:$0xff]  ;;  %v1907_v19 = vpack.c.bf16 %v1714_v11, %v1706_v10  ;;  %v1913_v20 = vpack.c.bf16 %v1716_v13, %v1708_v12 }
  0x15   :  { %1882 = vmatprep.subr.msk.bf16.mxu0 %vm2067_vm2, %v1880_v44  ;;  %1888 = vmatprep.subr.msk.bf16.mxu1 %vm2067_vm2, %v1886_v45  ;;  %v1747_v17 = vld [vmem:[%s2492_s1 + $0x1d8] sm:$0x3]  ;;  %v1916_v21 = vpack.c.bf16 %v1745_v15, %v1737_v14  ;;  %v1701_v23 = vld [vmem:[%s2493_s0 + $0x28] sm:$0x3]  ;;  %v1736_v24 = vld [vmem:[%s2492_s1 + $0x180] sm:$0xff] }
  0x16   :  { %1679 = vmatmul.mubr.msk.f32.gmra.mrb[6].mxu0 %vm72_vm3, %v1651_v32  ;;  %1683 = vmatmul.mubr.msk.f32.gmra.mrb[6].mxu1 %vm72_vm3, %v1651_v32  ;;  %v1922_v22 = vpack.c.bf16 %v1747_v17, %v1739_v16  ;;  %v1744_v25 = vld [vmem:[%s2492_s1 + $0x1c0] sm:$0x3]  ;;  %v1738_v26 = vld [vmem:[%s2492_s1 + $0x190] sm:$0xff]  ;;  %v1741_v28 = vld [vmem:[%s2492_s1 + $0x1a8] sm:$0xff] }
  0x17   :  { %506 = vmatprep.mubr.f32.mxu0 %v2033_v3  ;;  %583 = vmatprep.mubr.f32.mxu1 %v2033_v3  ;;  %v1746_v27 = vld [vmem:[%s2492_s1 + $0x1d0] sm:$0x3]  ;;  %v1749_v29 = vld [vmem:[%s2492_s1 + $0x1e8] sm:$0x3]  ;;  %v1743_v30 = vld [vmem:[%s2492_s1 + $0x1b8] sm:$0xff]  ;;  %v1919_v32 = vpack.c.bf16 %v1744_v25, %v1736_v24 }
  0x18   :  { %v1751_v31 = vld [vmem:[%s2492_s1 + $0x1f8] sm:$0x3]  ;;  %v1925_v33 = vpack.c.bf16 %v1746_v27, %v1738_v26  ;;  %v1928_v34 = vpack.c.bf16 %v1749_v29, %v1741_v28  ;;  %v1740_v36 = vld [vmem:[%s2492_s1 + $0x1a0] sm:$0xff]  ;;  %v1742_v38 = vld [vmem:[%s2492_s1 + $0x1b0] sm:$0xff] }
  0x19   :  { %v1934_v35 = vpack.c.bf16 %v1751_v31, %v1743_v30  ;;  %v1748_v37 = vld [vmem:[%s2492_s1 + $0x1e0] sm:$0x3]  ;;  %v1750_v39 = vld [vmem:[%s2492_s1 + $0x1f0] sm:$0x3]  ;;  %v1735_v43 = vld [vmem:[%s2493_s0 + $0x38] sm:$0x3] }
  0x1a   :  { %1686 = vmatmul.mubr.msk.f32.vlgmr.msra.gmra.mrb[0].mxu0 %vm72_vm3, %v34_v54  ;;  %1690 = vmatmul.mubr.msk.f32.vlgmr.msra.gmra.mrb[0].mxu1 %vm72_vm3, %v34_v54  ;;  %v1734_v40 = vld [vmem:[%s2493_s0 + $0x30] sm:$0xff]  ;;  %v1931_v41 = vpack.c.bf16 %v1748_v37, %v1740_v36  ;;  %v1937_v42 = vpack.c.bf16 %v1750_v39, %v1742_v38  ;;  %v1514_v14 = vld [vmem:[%s2494_s2] sm:$0xff]  ;;  %v1515_v16 = vld [vmem:[%s2494_s2 + $0x8] sm:$0xff] }
  0x1b   :  { %1885 = vmatpush1.bf16.msk.msra.mxu0 %vm2067_vm2, %v1883_v55  ;;  %512 = vmatprep.mubr.f32.mxu0 %v2033_v3  ;;  %v1518_v15 = vld [vmem:[%s2494_s2 + $0x20] sm:$0xff]  ;;  %v1519_v17 = vld [vmem:[%s2494_s2 + $0x28] sm:$0xff] }
  0x1c   :  { %589 = vmatprep.mubr.f32.mxu1 %v2033_v3  ;;  %1891 = vmatpush1.bf16.msk.msra.mxu1 %vm2067_vm2, %v1889_v56 }
  0x1d   :  { %1894 = vmatprep.subr.msk.bf16.mxu0 %vm2067_vm2, %v1892_v57  ;;  %1900 = vmatprep.subr.msk.bf16.mxu1 %vm2067_vm2, %v1898_v58 }
  0x1e   :  { %1687 = vmatmul.mubr.msk.f32.gmra.mrb[2].mxu0 %vm72_vm3, %v35_v59  ;;  %1691 = vmatmul.mubr.msk.f32.gmra.mrb[2].mxu1 %vm72_vm3, %v35_v59 }
  0x1f   :  { %660 = vmatprep.mubr.f32.mxu0 %v2033_v3  ;;  %737 = vmatprep.mubr.f32.mxu1 %v2033_v3 }
  0x22   :  { %1694 = vmatmul.mubr.msk.f32.vlgmr.msra.gmra.mrb[4].mxu0 %vm72_vm3, %v34_v54  ;;  %1698 = vmatmul.mubr.msk.f32.vlgmr.msra.gmra.mrb[4].mxu1 %vm72_vm3, %v34_v54 }
  0x23   :  { %1897 = vmatpush1.bf16.msk.msra.mxu0 %vm2067_vm2, %v1895_v6  ;;  %666 = vmatprep.mubr.f32.mxu0 %v2033_v3 }
  0x24   :  { %743 = vmatprep.mubr.f32.mxu1 %v2033_v3  ;;  %1903 = vmatpush1.bf16.msk.msra.mxu1 %vm2067_vm2, %v1901_v7 }
  0x25   :  { %1906 = vmatprep.subr.msk.bf16.mxu0 %vm2067_vm2, %v1904_v8  ;;  %1912 = vmatprep.subr.msk.bf16.mxu1 %vm2067_vm2, %v1910_v9 }
  0x26   :  { %1695 = vmatmul.mubr.msk.f32.gmra.mrb[6].mxu0 %vm72_vm3, %v35_v59  ;;  %1699 = vmatmul.mubr.msk.f32.gmra.mrb[6].mxu1 %vm72_vm3, %v35_v59 }
  0x27   :  { %864 = vmatprep.mubr.f32.mxu0 %v2033_v3  ;;  %941 = vmatprep.mubr.f32.mxu1 %v2033_v3 }
  0x2a   :  { %1720 = vmatmul.mubr.msk.f32.vlgmr.msra.gmra.mrb[0].mxu0 %vm72_vm3, %v1700_v18  ;;  %1724 = vmatmul.mubr.msk.f32.vlgmr.msra.gmra.mrb[0].mxu1 %vm72_vm3, %v1700_v18 }
  0x2b   :  { %1909 = vmatpush1.bf16.msk.msra.mxu0 %vm2067_vm2, %v1907_v19  ;;  %870 = vmatprep.mubr.f32.mxu0 %v2033_v3  ;;  %v1520_v19 = vld [vmem:[%s2494_s2 + $0x30] sm:$0xff] }
  0x2c   :  { %947 = vmatprep.mubr.f32.mxu1 %v2033_v3  ;;  %1915 = vmatpush1.bf16.msk.msra.mxu1 %vm2067_vm2, %v1913_v20  ;;  %v1517_v20 = vld [vmem:[%s2494_s2 + $0x18] sm:$0xff] }
  0x2d   :  { %1918 = vmatprep.subr.msk.bf16.mxu0 %vm2067_vm2, %v1916_v21  ;;  %1924 = vmatprep.subr.msk.bf16.mxu1 %vm2067_vm2, %v1922_v22  ;;  %v1538_v21 = vstv %s2495_s3 }
  0x2e   :  { %1721 = vmatmul.mubr.msk.f32.gmra.mrb[2].mxu0 %vm72_vm3, %v1701_v23  ;;  %1725 = vmatmul.mubr.msk.f32.gmra.mrb[2].mxu1 %vm72_vm3, %v1701_v23 }
  0x2f   :  { %1018 = vmatprep.mubr.f32.mxu0 %v2033_v3  ;;  %1095 = vmatprep.mubr.f32.mxu1 %v2033_v3 }
  0x32   :  { %1728 = vmatmul.mubr.msk.f32.vlgmr.msra.gmra.mrb[4].mxu0 %vm72_vm3, %v1700_v18  ;;  %1732 = vmatmul.mubr.msk.f32.vlgmr.msra.gmra.mrb[4].mxu1 %vm72_vm3, %v1700_v18  ;;  %v1516_v18 = vld [vmem:[%s2494_s2 + $0x10] sm:$0xff] }
  0x33   :  { %1921 = vmatpush1.bf16.msk.msra.mxu0 %vm2067_vm2, %v1919_v32  ;;  %1024 = vmatprep.mubr.f32.mxu0 %v2033_v3 }
  0x34   :  { %1101 = vmatprep.mubr.f32.mxu1 %v2033_v3  ;;  %1927 = vmatpush1.bf16.msk.msra.mxu1 %vm2067_vm2, %v1925_v33 }
  0x35   :  { %1930 = vmatprep.subr.msk.bf16.mxu0 %vm2067_vm2, %v1928_v34  ;;  %1936 = vmatprep.subr.msk.bf16.mxu1 %vm2067_vm2, %v1934_v35 }
  0x36   :  { %1729 = vmatmul.mubr.msk.f32.gmra.mrb[6].mxu0 %vm72_vm3, %v1701_v23  ;;  %1733 = vmatmul.mubr.msk.f32.gmra.mrb[6].mxu1 %vm72_vm3, %v1701_v23 }
  0x37   :  { %1238 = vmatprep.mubr.f32.mxu0 %v2033_v3  ;;  %1315 = vmatprep.mubr.f32.mxu1 %v2033_v3 }
  0x3a   :  { %1754 = vmatmul.mubr.msk.f32.vlgmr.msra.gmra.mrb[0].mxu0 %vm72_vm3, %v1734_v40  ;;  %1758 = vmatmul.mubr.msk.f32.vlgmr.msra.gmra.mrb[0].mxu1 %vm72_vm3, %v1734_v40 }
  0x3b   :  { %1244 = vmatprep.mubr.f32.mxu0 %v2033_v3  ;;  %1321 = vmatprep.mubr.f32.mxu1 %v2033_v3 }
  0x3c   :  { %1933 = vmatpush1.bf16.msk.msra.mxu0 %vm2067_vm2, %v1931_v41  ;;  %1939 = vmatpush1.bf16.msk.msra.mxu1 %vm2067_vm2, %v1937_v42 }
  0x3d   :  { %1940 = vmatprep.subr.bf16.mxu0 %v2034_v2  ;;  %1964 = vmatprep.subr.bf16.mxu1 %v2034_v2 }
  0x3e   :  { %1755 = vmatmul.mubr.msk.f32.gmra.mrb[2].mxu0 %vm72_vm3, %v1735_v43  ;;  %1759 = vmatmul.mubr.msk.f32.gmra.mrb[2].mxu1 %vm72_vm3, %v1735_v43 }
  0x3f   :  { %1392 = vmatprep.mubr.f32.mxu0 %v2033_v3  ;;  %1469 = vmatprep.mubr.f32.mxu1 %v2033_v3 }
  0x42   :  { %1762 = vmatmul.mubr.msk.f32.vlgmr.msra.gmra.mrb[4].mxu0 %vm72_vm3, %v1734_v40  ;;  %1766 = vmatmul.mubr.msk.f32.vlgmr.msra.gmra.mrb[4].mxu1 %vm72_vm3, %v1734_v40 }
  0x43   :  { %1398 = vmatprep.mubr.f32.mxu0 %v2033_v3  ;;  %1475 = vmatprep.mubr.f32.mxu1 %v2033_v3 }
  0x46   :  { %1763 = vmatmul.mubr.msk.f32.gmra.mrb[6].mxu0 %vm72_vm3, %v1735_v43  ;;  %1767 = vmatmul.mubr.msk.f32.gmra.mrb[6].mxu1 %vm72_vm3, %v1735_v43 }
  0x47   :  { %1823 = vmatprep.mubr.msk.f32.mxu0 %vm2035_vm4, %v2033_v3  ;;  %1835 = vmatprep.mubr.msk.f32.mxu1 %vm2035_vm4, %v2033_v3 }
 0x10d   :  { %v1240_v44 = vpop.f32.mrb[0].mxu0  ;;  %v1317_v45 = vpop.f32.mrb[0].mxu1 }
 0x10e   :  { %v1242_v46 = vpop.f32.mrb[1].mxu0  ;;  %v1319_v47 = vpop.f32.mrb[1].mxu1 }
 0x111   :  { %v1246_v48 = vpop.f32.mrb[2].mxu0  ;;  %v1323_v49 = vpop.f32.mrb[2].mxu1 }
 0x112   :  { %1499 = vst [vmem:[#allocation2 + $0x8] sm:$0x3] %v1246_v48  ;;  %1503 = vst [vmem:[#allocation2 + $0x28] sm:$0x3] %v1323_v49  ;;  %v1248_v50 = vpop.f32.mrb[3].mxu0  ;;  %v1325_v51 = vpop.f32.mrb[3].mxu1 }
 0x113   :  { %1501 = vst [vmem:[#allocation2 + $0x18] sm:$0x3] %v1248_v50  ;;  %1505 = vst [vmem:[#allocation2 + $0x38] sm:$0x3] %v1325_v51 }
 0x115   :  { %v1394_v52 = vpop.f32.mrb[4].mxu0  ;;  %v1471_v53 = vpop.f32.mrb[4].mxu1 }
 0x116   :  { %v1396_v54 = vpop.f32.mrb[5].mxu0  ;;  %v1473_v55 = vpop.f32.mrb[5].mxu1 }
 0x119   :  { %v1400_v56 = vpop.f32.mrb[6].mxu0  ;;  %v1477_v57 = vpop.f32.mrb[6].mxu1  ;;  %v1522_v58 = vld [vmem:[#allocation2 + $0x8] sm:$0xff] }
 0x11a   :  { %1507 = vst [vmem:[#allocation2 + $0x48] sm:$0x3] %v1400_v56  ;;  %1511 = vst [vmem:[#allocation2 + $0x68] sm:$0x3] %v1477_v57  ;;  %v1402_v59 = vpop.f32.mrb[7].mxu0  ;;  %v1479_v60 = vpop.f32.mrb[7].mxu1  ;;  %v1941_v61 = vpack.c.bf16 %v1522_v58, %v1240_v44 }
 0x11b   :  { %1509 = vst [vmem:[#allocation2 + $0x58] sm:$0x3] %v1402_v59  ;;  %1513 = vst [vmem:[#allocation2 + $0x78] sm:$0x3] %v1479_v60  ;;  %v1524_v62 = vld [vmem:[#allocation2 + $0x18] sm:$0xff]  ;;  %v1526_v0 = vld [vmem:[#allocation2 + $0x28] sm:$0xff] }
 0x11c   :  { %1942 = vmatpush3.bf16.msra.mxu0 %v1941_v61  ;;  %1972 = vmatpush3.bf16.msra.mxu1 %v1941_v61  ;;  %v1944_v63 = vpack.c.bf16 %v1524_v62, %v1242_v46  ;;  %v1947_v1 = vpack.c.bf16 %v1526_v0, %v1317_v45  ;;  %v1528_v4 = vld [vmem:[#allocation2 + $0x38] sm:$0xff] }
 0x11d   :  { %1943 = vmatprep.subr.bf16.mxu0 %v2034_v2  ;;  %1965 = vmatprep.subr.bf16.mxu1 %v2034_v2  ;;  %v1950_v5 = vpack.c.bf16 %v1528_v4, %v1319_v47 }
 0x120   :  { %1945 = vmatpush3.bf16.msra.mxu0 %v1944_v63  ;;  %1973 = vmatpush3.bf16.msra.mxu1 %v1944_v63 }
 0x121   :  { %1946 = vmatprep.subr.bf16.mxu0 %v2034_v2  ;;  %1966 = vmatprep.subr.bf16.mxu1 %v2034_v2  ;;  %v1530_v6 = vld [vmem:[#allocation2 + $0x48] sm:$0xff] }
 0x122   :  { %v1953_v7 = vpack.c.bf16 %v1530_v6, %v1394_v52  ;;  %v1532_v8 = vld [vmem:[#allocation2 + $0x58] sm:$0xff]  ;;  %v1534_v10 = vld [vmem:[#allocation2 + $0x68] sm:$0xff] }
 0x123   :  { %v1956_v9 = vpack.c.bf16 %v1532_v8, %v1396_v54  ;;  %v1959_v11 = vpack.c.bf16 %v1534_v10, %v1471_v53  ;;  %v1536_v12 = vld [vmem:[#allocation2 + $0x78] sm:$0xff] }
 0x124   :  { %1948 = vmatpush3.bf16.msra.mxu0 %v1947_v1  ;;  %1974 = vmatpush3.bf16.msra.mxu1 %v1947_v1  ;;  %v1962_v13 = vpack.c.bf16 %v1536_v12, %v1473_v55 }
 0x125   :  { %1949 = vmatprep.subr.bf16.mxu0 %v2034_v2  ;;  %1967 = vmatprep.subr.bf16.mxu1 %v2034_v2 }
 0x128   :  { %1951 = vmatpush3.bf16.msra.mxu0 %v1950_v5  ;;  %1975 = vmatpush3.bf16.msra.mxu1 %v1950_v5 }
 0x129   :  { %1952 = vmatprep.subr.bf16.mxu0 %v2034_v2  ;;  %1968 = vmatprep.subr.bf16.mxu1 %v2034_v2 }
 0x12c   :  { %1954 = vmatpush3.bf16.msra.mxu0 %v1953_v7  ;;  %1976 = vmatpush3.bf16.msra.mxu1 %v1953_v7 }
 0x12d   :  { %1955 = vmatprep.subr.bf16.mxu0 %v2034_v2  ;;  %1969 = vmatprep.subr.bf16.mxu1 %v2034_v2 }
 0x130   :  { %1957 = vmatpush3.bf16.msra.mxu0 %v1956_v9  ;;  %1977 = vmatpush3.bf16.msra.mxu1 %v1956_v9 }
 0x131   :  { %1958 = vmatprep.subr.bf16.mxu0 %v2034_v2  ;;  %1970 = vmatprep.subr.bf16.mxu1 %v2034_v2 }
 0x134   :  { %1960 = vmatpush3.bf16.msra.mxu0 %v1959_v11  ;;  %1978 = vmatpush3.bf16.msra.mxu1 %v1959_v11 }
 0x135   :  { %1961 = vmatprep.subr.bf16.mxu0 %v2034_v2  ;;  %1971 = vmatprep.subr.bf16.mxu1 %v2034_v2 }
 0x138   :  { %1963 = vmatpush3.bf16.msra.mxu0 %v1962_v13  ;;  %1979 = vmatpush3.bf16.msra.mxu1 %v1962_v13 }
 0x13b   :  { %1824 = vmatmul.mubr.f32.vlgmr.msra.gmra.mrb[8].mxu0 %v1514_v14  ;;  %1836 = vmatmul.mubr.f32.vlgmr.msra.gmra.mrb[8].mxu1 %v1518_v15 }
 0x13c   :  { %1826 = vmatprep.mubr.msk.f32.mxu0 %vm2035_vm4, %v2033_v3  ;;  %1838 = vmatprep.mubr.msk.f32.mxu1 %vm2035_vm4, %v2033_v3 }
 0x13f   :  { %1827 = vmatmul.mubr.f32.gmra.mrb[10].mxu0 %v1515_v16  ;;  %1839 = vmatmul.mubr.f32.gmra.mrb[10].mxu1 %v1519_v17 }
 0x140   :  { %1829 = vmatprep.mubr.msk.f32.mxu0 %vm2035_vm4, %v2033_v3  ;;  %1841 = vmatprep.mubr.msk.f32.mxu1 %vm2035_vm4, %v2033_v3 }
 0x143   :  { %1830 = vmatmul.mubr.f32.gmra.mrb[12].mxu0 %v1516_v18  ;;  %1842 = vmatmul.mubr.f32.gmra.mrb[12].mxu1 %v1520_v19 }
 0x144   :  { %1832 = vmatprep.mubr.msk.f32.mxu0 %vm2035_vm4, %v2033_v3 }
 0x147   :  { %1833 = vmatmul.mubr.f32.gmra.mrb[14].mxu0 %v1517_v20 }
 0x20e   :  { %v1605_v22 = vpop.f32.mrb[8].mxu0  ;;  %v1625_v23 = vpop.f32.mrb[8].mxu1 }
 0x20f   :  { %v1606_v24 = vadd.f32 %v1605_v22, %v1538_v21  ;;  %v1825_v25 = vpop.f32.mrb[9].mxu0  ;;  %v1626_v26 = vadd.f32 %v1625_v23, %v1538_v21  ;;  %v1837_v27 = vpop.f32.mrb[9].mxu1 }
 0x211   :  { %1639 = vst [vmem:[%s2496_s4] sm:$0xff] %v1606_v24  ;;  %1643 = vst [vmem:[%s2496_s4 + $0x20] sm:$0xff] %v1626_v26 }
 0x212   :  { %v1610_v3 = vpop.f32.mrb[10].mxu0  ;;  %v1630_v28 = vpop.f32.mrb[10].mxu1 }
 0x213   :  { %v1611_v29 = vadd.f32 %v1610_v3, %v1538_v21  ;;  %v1828_v30 = vpop.f32.mrb[11].mxu0  ;;  %v1631_v31 = vadd.f32 %v1630_v28, %v1538_v21  ;;  %v1840_v32 = vpop.f32.mrb[11].mxu1 }
 0x215   :  { %1640 = vst [vmem:[%s2496_s4 + $0x8] sm:$0xff] %v1611_v29  ;;  %1644 = vst [vmem:[%s2496_s4 + $0x28] sm:$0xff] %v1631_v31 }
 0x216   :  { %v1615_v33 = vpop.f32.mrb[12].mxu0  ;;  %v1635_v34 = vpop.f32.mrb[12].mxu1 }
 0x217   :  { %v1616_v35 = vadd.f32 %v1615_v33, %v1538_v21  ;;  %v1831_v36 = vpop.f32.mrb[13].mxu0  ;;  %v1636_v37 = vadd.f32 %v1635_v34, %v1538_v21  ;;  %v1843_v38 = vpop.f32.mrb[13].mxu1 }
 0x219   :  { %1641 = vst [vmem:[%s2496_s4 + $0x10] sm:$0xff] %v1616_v35  ;;  %1645 = vst [vmem:[%s2496_s4 + $0x30] sm:$0xff] %v1636_v37 }
 0x21a   :  { %v1620_v39 = vpop.f32.mrb[14].mxu0 }
 0x21b   :  { %v1621_v40 = vadd.f32 %v1620_v39, %v1538_v21  ;;  %v1834_v41 = vpop.f32.mrb[15].mxu0 }
 0x21d   :  { %1642 = vst [vmem:[%s2496_s4 + $0x18] sm:$0xff] %v1621_v40 }

</bundles_post_ra>
